<compile_context>
chip_gen: v6e
topology: v6e:2x2x1
jax: 0.10.0
libtpu: 0.0.40
codegen_flags: <defaults>
</compile_context>

<pallas_src>
import functools

import jax
import jax.numpy as jnp
from jax.experimental import pallas as pl
from jax.experimental.pallas import tpu as pltpu


def _round_up(n, m):
    return ((n + m - 1) // m) * m


def _logreg_kernel(x_ref, w_ref, b_ref, o_ref):
    # x_ref: (TB, D) VMEM          w_ref: (1, D) f32 VMEM (grid-resident)
    # b_ref: (1,)   f32 SMEM       o_ref: (2, TB) f32 VMEM  (row0 = 1-p, row1 = p)
    tb = x_ref.shape[0]
    x = x_ref[...].astype(jnp.float32)            # upcast in-vreg if x is bf16
    w = w_ref[...]                                # (1, D)

    # Per-row dot product: VPU broadcast-multiply + XLU lane reduce (D <= 128).
    z_col = jnp.sum(x * w, axis=-1, keepdims=True)            # (TB, 1) sublane-major

    # Relayout to lane-dense (1, TB): sigmoid then runs on TB/128 vregs instead
    # of TB/8, and the output store is lane-dense instead of masked 2-lane stores.
    z = z_col.reshape(1, tb) + b_ref[0]
    p = jax.nn.sigmoid(z)                                      # EUP exp/recip

    # Write the two output rows directly (matches PyTorch: 1 - sigmoid, sigmoid).
    o_ref[0:1, :] = 1.0 - p
    o_ref[1:2, :] = p


def _choose_tile(batch, tb):
    """Lane-aligned batch tile; keeps the grid >= 2 for non-tiny batches."""
    tb = max(128, (int(tb) // 128) * 128)
    if batch <= 256:
        return batch                      # single full-array block (always legal)
    half = _round_up(pl.cdiv(batch, 2), 128)
    return min(tb, half)


@functools.partial(jax.jit, static_argnames=("tb",))
def logistic_regressor_forward(x, weight, bias, tb=8192):
    """x: (B, D) f32/bf16, weight: (1, D) (PyTorch Linear layout), bias: (1,)."""
    B, D = x.shape
    w = weight.astype(jnp.float32).reshape(1, D)
    b = bias.astype(jnp.float32).reshape(1)

    tb_eff = _choose_tile(B, tb)
    grid = (pl.cdiv(B, tb_eff),)

    # VMEM budget (double-buffered, lane/sublane-padded tiles).
    lanes = _round_up(D, 128)
    vmem_need = (2 * tb_eff * lanes * x.dtype.itemsize   # x tiles
                 + 2 * 8 * tb_eff * 4                    # (2, TB) output tiles
                 + 2 * 8 * lanes * 4)                    # resident weight tile
    ckw = dict(dimension_semantics=("parallel",))
    if vmem_need > (12 << 20):
        ckw["vmem_limit_bytes"] = min(int(vmem_need * 3 // 2) + (4 << 20), 60 << 20)

    out_2xB = pl.pallas_call(
        _logreg_kernel,
        out_shape=jax.ShapeDtypeStruct((2, B), jnp.float32),
        grid=grid,
        in_specs=[
            pl.BlockSpec((tb_eff, D), lambda i: (i, 0)),            # x tile
            pl.BlockSpec((1, D), lambda i: (0, 0)),                 # weight row (resident)
            pl.BlockSpec(memory_space=pltpu.MemorySpace.SMEM),      # bias scalar
        ],
        out_specs=pl.BlockSpec((2, tb_eff), lambda i: (0, i)),
        compiler_params=pltpu.CompilerParams(**ckw),
    )(x, w, b)

    # Tiny (2, B) -> (B, 2) transpose in the wrapper (lane-dense kernel output).
    return out_2xB.T


if __name__ == "__main__":
    key = jax.random.PRNGKey(0)
    kx, kw, kb = jax.random.split(key, 3)

    B, INPUT_DIM, OUTPUT_DIM = 8, 23, 2   # module defaults: Linear(23, 1)

    x = jax.random.normal(kx, (B, INPUT_DIM), dtype=jnp.float32)
    # Deterministic "Kaiming-uniform-like" init consistent with nn.Linear shapes.
    bound = 1.0 / (INPUT_DIM ** 0.5)
    weight = jax.random.uniform(kw, (OUTPUT_DIM - 1, INPUT_DIM),
                                minval=-bound, maxval=bound, dtype=jnp.float32)
    bias = jax.random.uniform(kb, (OUTPUT_DIM - 1,),
                              minval=-bound, maxval=bound, dtype=jnp.float32)

    out = logistic_regressor_forward(x, weight, bias)
    out = jax.block_until_ready(out)

    # Reference check in plain JAX.
    z_ref = x @ weight.T + bias
    p_ref = jax.nn.sigmoid(z_ref)
    ref = jnp.concatenate([1.0 - p_ref, p_ref], axis=1)
    assert out.shape == (B, 2), out.shape
    assert jnp.allclose(out, ref, atol=1e-5, rtol=1e-5), (out, ref)

    # Larger, non-tile-aligned batch: exercises the cdiv grid, the masked
    # partial last block (no wrapper-side padding), and the >=2-step grid.
    B2 = 2500
    x2 = jax.random.normal(jax.random.PRNGKey(1), (B2, INPUT_DIM), dtype=jnp.float32)
    out2 = jax.block_until_ready(logistic_regressor_forward(x2, weight, bias))
    p2 = jax.nn.sigmoid(x2 @ weight.T + bias)
    ref2 = jnp.concatenate([1.0 - p2, p2], axis=1)
    assert out2.shape == (B2, 2), out2.shape
    assert jnp.allclose(out2, ref2, atol=1e-5, rtol=1e-5)

    print("KERNEL_OK")
</pallas_src>

<mosaic_0001>
module attributes {stable_mosaic.version = 11 : i64} {
  func.func @_logreg_kernel(%arg0: i32, %arg1: memref<8x23xf32, #tpu.memory_space<vmem>>, %arg2: memref<1x23xf32, #tpu.memory_space<vmem>>, %arg3: memref<1xf32, #tpu.memory_space<smem>>, %arg4: memref<2x8xf32, #tpu.memory_space<vmem>>) attributes {dimension_semantics = [#tpu.dimension_semantics<parallel>], iteration_bounds = array<i64: 1>, scalar_prefetch = 0 : i64, scratch_operands = 0 : i64, tpu.core_type = #tpu.core_type<tc>, window_params = [{transform_indices = @transform_0, window_bounds = array<i64: 8, 23>}, {pipeline_mode = #tpu.pipeline_mode<synchronous>, transform_indices = @transform_1, window_bounds = array<i64: 1, 23>}, {transform_indices = @transform_2, window_bounds = array<i64: 1>}, {transform_indices = @transform_3, window_bounds = array<i64: 2, 8>}]} {
    %c0 = arith.constant 0 : index
    %c0_0 = arith.constant 0 : index
    %0 = vector.load %arg1[%c0, %c0_0] : memref<8x23xf32, #tpu.memory_space<vmem>>, vector<8x23xf32>
    %c0_1 = arith.constant 0 : index
    %c0_2 = arith.constant 0 : index
    %1 = vector.load %arg2[%c0_1, %c0_2] : memref<1x23xf32, #tpu.memory_space<vmem>>, vector<1x23xf32>
    %2 = vector.broadcast %1 : vector<1x23xf32> to vector<8x23xf32>
    %3 = arith.mulf %0, %2 : vector<8x23xf32>
    %cst = arith.constant dense<0.000000e+00> : vector<8xf32>
    %4 = vector.multi_reduction <add>, %3, %cst [1] : vector<8x23xf32> to vector<8xf32>
    %5 = vector.shape_cast %4 : vector<8xf32> to vector<8x1xf32>
    %6 = vector.shape_cast %5 : vector<8x1xf32> to vector<1x8xf32>
    %c0_3 = arith.constant 0 : index
    %7 = memref.load %arg3[%c0_3] : memref<1xf32, #tpu.memory_space<smem>>
    %8 = vector.broadcast %7 : f32 to vector<1x8xf32>
    %9 = arith.addf %6, %8 : vector<1x8xf32>
    %10 = arith.negf %9 : vector<1x8xf32>
    %11 = math.exp %10 : vector<1x8xf32>
    %cst_4 = arith.constant 1.000000e+00 : f32
    %12 = vector.broadcast %cst_4 : f32 to vector<1x8xf32>
    %13 = arith.addf %12, %11 : vector<1x8xf32>
    %14 = arith.divf %12, %13 : vector<1x8xf32>
    %cst_5 = arith.constant 1.000000e+00 : f32
    %15 = vector.broadcast %cst_5 : f32 to vector<1x8xf32>
    %16 = arith.subf %15, %14 : vector<1x8xf32>
    %c0_6 = arith.constant 0 : index
    %c0_7 = arith.constant 0 : index
    %17 = vector.load %arg4[%c0_6, %c0_7] : memref<2x8xf32, #tpu.memory_space<vmem>>, vector<1x8xf32>
    tpu.vector_store %arg4[%c0_6, %c0_7], %16 {strides = array<i32>} : memref<2x8xf32, #tpu.memory_space<vmem>>, vector<1x8xf32>,
    %c1 = arith.constant 1 : index
    %c0_8 = arith.constant 0 : index
    %18 = vector.load %arg4[%c1, %c0_8] : memref<2x8xf32, #tpu.memory_space<vmem>>, vector<1x8xf32>
    tpu.vector_store %arg4[%c1, %c0_8], %14 {strides = array<i32>} : memref<2x8xf32, #tpu.memory_space<vmem>>, vector<1x8xf32>,
    return
  }
  func.func @transform_0(%arg0: i32) -> (i32, i32) {
    %c0_i32 = arith.constant 0 : i32
    %c0_i32_0 = arith.constant 0 : i32
    return %arg0, %c0_i32 : i32, i32
  }
  func.func @transform_1(%arg0: i32) -> (i32, i32) {
    %c0_i32 = arith.constant 0 : i32
    %c0_i32_0 = arith.constant 0 : i32
    %c0_i32_1 = arith.constant 0 : i32
    return %c0_i32, %c0_i32_0 : i32, i32
  }
  func.func @transform_2(%arg0: i32) -> i32 {
    %c0_i32 = arith.constant 0 : i32
    %c0_i32_0 = arith.constant 0 : i32
    return %c0_i32 : i32
  }
  func.func @transform_3(%arg0: i32) -> (i32, i32) {
    %c0_i32 = arith.constant 0 : i32
    %c0_i32_0 = arith.constant 0 : i32
    return %c0_i32, %arg0 : i32, i32
  }
}

</mosaic_0001>

<bundles_post_ra>
// kernel: logistic_regressor_forward.1
= control target key start
LH: loop header
LB: loop body
LE: loop exit
PB: predicated region body
PF: predicated region fallthrough
CT: control target
= control target key end

     0   :  { %9 = vsyncpa [#allocation4], 0  ;;  %s169_s0 = inlined_call_operand.hbm [shape: f32[8,23], index: 0, kind: input, shape index: {}]   ;;  %s170_s1 = inlined_call_operand.vmem [shape: f32[1,23], index: 1, kind: input, shape index: {}]   ;;  %s171_s2 = inlined_call_operand.<no memory space> [shape: f32[1], index: 2, kind: input, shape index: {}]   ;;  %s172_s3 = inlined_call_operand.hbm [shape: f32[2,8], index: 3, kind: output, shape index: {}]  }
   0x1   :  { %10 = vsyncpa [#allocation5], 0  ;;  %s135_s12 = smov [#allocation3]  }
   0x2   :  { %s17_s13 = sshll.u32 %s135_s12, 4  ;;  %s18_s13 = int_to_ptr.vmem [resolvable:$true] %s17_s13 }
   0x3   :  { %s99_s14 = scalar_lea.vmem %s18_s13, 128  ;;  %p104_p1 = scmp.lt.s32.totalorder %s18_s13, %s18_s13 }
   0x4   :  { %p100_p0 = scmp.ne.s32.totalorder %s18_s13, %s99_s14  ;;  %p105_p2 = scmp.lt.s32.totalorder %s99_s14, %s99_s14 }
   0x6   :  { %p106_p3 = por %p105_p2, %p104_p1 }
   0x8   :  { %p107_p4 = pnand %p106_p3, %p100_p0 }
   0xa   :  { %110 = shalt.err (!%p107_p4)
}
   0xb   :  { %20 = dma.hbm_to_vmem [thread:$0]  %s169_s0, 128, %s18_s13, [#allocation4]  }
   0xc   :  { %131 = dma.done.wait [#allocation4], 128  }
   0xd   :  { %132 = vsyncadd [#allocation4], 4294967168  ;;  %v28_v0 = vld [vmem:[#allocation3] sm:$0xff]  ;;  %vm37_vm0 = vcmask 187392   ;;  %v42_v4 = vstv %s171_s2  ;;  %v52_v10 = vlaneseq  ;;  %vm59_vm1 = vcmask 57344   ;;  %s136_s0 = smov [#allocation6]  }
   0xe   :  { %v83_v1 = vld [vmem:[%s170_s1] ss:$0 sm:$0xff]  ;;  %s74_s1 = sshll.u32 %s136_s0, 4  ;;  %s75_s1 = int_to_ptr.vmem [resolvable:$true] %s74_s1 }
   0xf   :  { %v36_v2 = vmul.f32 %v83_v1, %v28_v0  ;;  %v53_v11 = vand.u32 127, %v52_v10  ;;  %v55_v12 = vshrl.u32 %v52_v10, 7  ;;  %s111_s2 = scalar_lea.vmem %s75_s1, 32  ;;  %p116_p6 = scmp.lt.s32.totalorder %s75_s1, %s75_s1 }
  0x10   :  { %p112_p5 = scmp.ne.s32.totalorder %s75_s1, %s111_s2  ;;  %p117_p7 = scmp.lt.s32.totalorder %s111_s2, %s111_s2 }
  0x11   :  { %v38_v3 = vsel %vm37_vm0, %v36_v2, 0.0  ;;  %v56_v13 = vsub.s32 %v53_v11, %v55_v12 }
  0x12   :  { %39 = vadd.xlane.f32.xlu0 %v38_v3  ;;  %p118_p8 = por %p117_p7, %p116_p6 }
  0x14   :  { %p119_p9 = pnand %p118_p8, %p112_p5 }
  0x9b   :  { %v40_v5 = vpop.xlane.xlu0 %39 }
  0x9c   :  { %v43_v6 = vadd.f32 %v42_v4, %v40_v5 }
  0x9e   :  { %v84_v7 = vmul.f32 -1.442695, %v43_v6 }
  0xa0   :  { %87 = vpow2.f32 %v84_v7 }
  0xad   :  { %v88_v8 = vpop.eup %87 }
  0xae   :  { %v47_v9 = vadd.f32 1.0, %v88_v8 }
  0xb0   :  { %89 = vrcp.f32 %v47_v9 }
  0xbd   :  { %v90_v14 = vpop.eup %89 }
  0xbe   :  { %v50_v15 = vsub.f32 1.0, %v90_v14  ;;  %v65_v16 = vrot.slane %v90_v14, %v56_v13 }
  0xc0   :  { %v57_v17 = vrot.slane %v50_v15, %v56_v13  ;;  %67 = vst.msk [vmem:[#allocation6 + $0x1] sm:$0x1] %vm59_vm1, %v65_v16 }
  0xc2   :  { %60 = vst.msk [vmem:[#allocation6] sm:$0x1] %vm59_vm1, %v57_v17 }
  0xc3   :  { %122 = shalt.err (!%p119_p9)
}
  0xc4   :  { %77 = dma.vmem_to_hbm [thread:$0]  %s75_s1, 32, %s172_s3, [#allocation5]  }
  0xc5   :  { %133 = dma.done.wait [#allocation5], 32  }
  0xc6   :  { %134 = vsyncadd [#allocation5], 4294967264 }
  0xc7   :  { %81 = vsyncpa [#allocation4], 1 }
  0xc8   :  { %82 = vsyncpa [#allocation5], 1 }

</bundles_post_ra>
